<compile_context>
chip_gen: v5e
topology: v5e:2x2
jax: 0.10.0
libtpu: 0.0.40
codegen_flags: <defaults>
</compile_context>

<pallas_src>
import jax
import jax.numpy as jnp
import numpy as np
from jax.experimental import pallas as pl
from jax.experimental.pallas import tpu as pltpu

D_MODEL = 32                              # in_channels (d_model)
REDUCTION = 2
INTER = max(D_MODEL // REDUCTION, 1)      # inter_channels = 16
_SCALE = 1.0 / float(np.sqrt(INTER))      # use_scale=True (embedded_gaussian)

# Packed parameter blob layout, shape (64, 48) f32 (rows 8-aligned):
_ROW_WTPG = 0                 # rows [ 0,32): w_tpg  (C, 3I)  theta cols pre-scaled
_ROW_WOUT = D_MODEL           # rows [32,48): w_out  (I, C)   in cols [0, C)
_ROW_BTPG = 48                # row   48   : b_tpg  (3I,)    theta part pre-scaled
_ROW_BOUT = 56                # row   56   : b_out  (C,)     in cols [0, C)
_BLOB_ROWS = 64
_BLOB_COLS = 3 * INTER        # 48


# ----------------------------- fused NonLocal2d kernel ----------------------
def _nonlocal_encoder_kernel(x_ref, p_ref, out_ref):
    """Entire NonLocal2d block + encoder output permute in one invocation.

    x_ref:   (N, C, HW) f32 -- NCHW input with H,W flattened (free reshape).
    p_ref:   (64, 48)   f32 -- all weights/biases packed into one blob.
    out_ref: (HW, N*C)  f32 -- already in (HW, N, C) output order.
    """
    N, C, HW = x_ref.shape

    # One in-VMEM minor-dims transpose to token layout; reused for the
    # projection AND the residual (replaces the wrapper-side XLA transpose).
    x_tok = jnp.transpose(x_ref[...], (0, 2, 1))            # (N, HW, C)
    xf = x_tok.reshape(N * HW, C)

    # Single packed parameter blob -> 8-aligned row slices.
    w_tpg = p_ref[_ROW_WTPG:_ROW_WTPG + C, :]                # (C, 3I)
    w_out = p_ref[_ROW_WOUT:_ROW_WOUT + INTER, 0:C]          # (I, C)
    b_tpg = p_ref[_ROW_BTPG:_ROW_BTPG + 1, :]                # (1, 3I)
    b_out = p_ref[_ROW_BOUT:_ROW_BOUT + 1, 0:C]              # (1, C)

    # Fused theta|phi|g 1x1-conv projection: one (N*HW, C) @ (C, 3I) matmul.
    # use_scale is already folded into the theta columns/bias of w_tpg/b_tpg.
    proj = jnp.dot(xf, w_tpg, preferred_element_type=jnp.float32) + b_tpg
    proj = proj.reshape(N, HW, 3 * INTER)
    theta = proj[:, :, 0 * INTER:1 * INTER]                  # (N, HW, I)
    phi = proj[:, :, 1 * INTER:2 * INTER]                    # (N, HW, I)
    g = proj[:, :, 2 * INTER:3 * INTER]                      # (N, HW, I)

    # embedded_gaussian: softmax(theta @ phi^T, axis=-1), per image.
    s = jnp.einsum('bqc,bkc->bqk', theta, phi,
                   preferred_element_type=jnp.float32)       # (N, HW, HW)
    s = s - jnp.max(s, axis=-1, keepdims=True)
    p = jnp.exp(s)
    # Exact reciprocal keeps the 1e-4 check tight; approx=True would move the
    # divide onto the idle EUP slot if a looser tolerance were acceptable.
    p = p * pl.reciprocal(jnp.sum(p, axis=-1, keepdims=True), approx=False)

    # y = pairwise @ g_x, then conv_out (1x1) + residual.
    y = jnp.einsum('bqk,bkc->bqc', p, g,
                   preferred_element_type=jnp.float32)       # (N, HW, I)
    yo = jnp.dot(y.reshape(N * HW, INTER), w_out,
                 preferred_element_type=jnp.float32) + b_out
    out_tok = x_tok + yo.reshape(N, HW, C)                   # (N, HW, C)

    # Store directly in (HW, N, C) order (flattened lanes = N*C). N is a tiny
    # static constant, so a static per-image lane-slab store avoids any
    # major-dim transpose inside the kernel.
    for n in range(N):
        out_ref[:, n * C:(n + 1) * C] = out_tok[n]


def nonlocal_encoder_pallas(x, params):
    """x: (N, C, H, W) float32.  Returns (H*W, N, C), matching
    NonLocalEncoder.forward(src) with norm=None (mask/pos args are unused)."""
    N, C, H, W = x.shape
    HW = H * W
    x_nchw = x.reshape(N, C, HW)      # free reshape — no XLA transpose op

    vmem = pl.BlockSpec(memory_space=pltpu.MemorySpace.VMEM)
    out = pl.pallas_call(
        _nonlocal_encoder_kernel,
        out_shape=jax.ShapeDtypeStruct((HW, N * C), jnp.float32),
        in_specs=[vmem, vmem],
        out_specs=vmem,
        # grid=() : single fully-VMEM-resident step; see header TODO for the
        # v7x multi-core / flash-softmax scaling path.
    )(x_nchw, params["packed"])

    # (HW, N*C) -> (HW, N, C): no-op row-major view, no transpose.
    return out.reshape(HW, N, C)


# ----------------------------- pure-JAX reference ---------------------------
def nonlocal_encoder_ref(x, raw):
    """Independent reference following the original PyTorch math (unscaled
    theta weights, explicit use_scale divide)."""
    N, C, H, W = x.shape
    HW = H * W
    xf = jnp.transpose(x.reshape(N, C, HW), (0, 2, 1))       # (N, HW, C)
    theta = xf @ raw["w_theta"] + raw["b_theta"]
    phi = xf @ raw["w_phi"] + raw["b_phi"]
    g = xf @ raw["w_g"] + raw["b_g"]
    s = jnp.einsum('bqc,bkc->bqk', theta, phi) * _SCALE
    p = jax.nn.softmax(s, axis=-1)
    y = jnp.einsum('bqk,bkc->bqc', p, g)
    yo = y @ raw["w_out"] + raw["b_out"]
    out = xf + yo
    return jnp.transpose(out, (1, 0, 2))                      # (HW, N, C)


# ----------------------------- deterministic params -------------------------
def init_params(key):
    ks = jax.random.split(key, 8)

    def w(k, shape, scale):
        return (scale * jax.random.normal(k, shape)).astype(jnp.float32)

    s_in = 1.0 / float(np.sqrt(D_MODEL))
    s_int = 1.0 / float(np.sqrt(INTER))
    raw = {
        "w_theta": w(ks[0], (D_MODEL, INTER), s_in),
        "w_phi": w(ks[1], (D_MODEL, INTER), s_in),
        "w_g": w(ks[2], (D_MODEL, INTER), s_in),
        "b_theta": w(ks[3], (INTER,), 0.1),
        "b_phi": w(ks[4], (INTER,), 0.1),
        "b_g": w(ks[5], (INTER,), 0.1),
        "w_out": w(ks[6], (INTER, D_MODEL), s_int),
        "b_out": w(ks[7], (D_MODEL,), 0.1),
    }

    # Fold use_scale into theta; pack everything into one (64, 48) blob.
    w_tpg = jnp.concatenate(
        [raw["w_theta"] * _SCALE, raw["w_phi"], raw["w_g"]], axis=1)   # (C, 3I)
    b_tpg = jnp.concatenate(
        [raw["b_theta"] * _SCALE, raw["b_phi"], raw["b_g"]])           # (3I,)

    blob = jnp.zeros((_BLOB_ROWS, _BLOB_COLS), jnp.float32)
    blob = blob.at[_ROW_WTPG:_ROW_WTPG + D_MODEL, :].set(w_tpg)
    blob = blob.at[_ROW_WOUT:_ROW_WOUT + INTER, 0:D_MODEL].set(raw["w_out"])
    blob = blob.at[_ROW_BTPG, :].set(b_tpg)
    blob = blob.at[_ROW_BOUT, 0:D_MODEL].set(raw["b_out"])

    return {"packed": blob, "raw": raw}


# ----------------------------- main ------------------------------------------
if __name__ == "__main__":
    B, C, H, W = 2, D_MODEL, 8, 8            # src: (batch, d_model, H, W)
    key = jax.random.PRNGKey(0)
    kx, kp = jax.random.split(key)
    src = jax.random.normal(kx, (B, C, H, W), jnp.float32)
    params = init_params(kp)

    out = nonlocal_encoder_pallas(src, params)
    out = jax.block_until_ready(out)
    ref = nonlocal_encoder_ref(src, params["raw"])

    assert out.shape == (H * W, B, C), out.shape
    np.testing.assert_allclose(np.asarray(out), np.asarray(ref),
                               atol=1e-4, rtol=1e-4)
    print("KERNEL_OK")
</pallas_src>

<mosaic_0001>
module attributes {stable_mosaic.version = 11 : i64} {
  func.func @_nonlocal_encoder_kernel(%arg0: memref<2x32x64xf32, #tpu.memory_space<vmem>>, %arg1: memref<64x48xf32, #tpu.memory_space<vmem>>, %arg2: memref<64x64xf32, #tpu.memory_space<vmem>>) attributes {dimension_semantics = [], scalar_prefetch = 0 : i64, scratch_operands = 0 : i64, tpu.core_type = #tpu.core_type<tc>} {
    %c0 = arith.constant 0 : index
    %c0_0 = arith.constant 0 : index
    %c0_1 = arith.constant 0 : index
    %0 = vector.load %arg0[%c0, %c0_0, %c0_1] : memref<2x32x64xf32, #tpu.memory_space<vmem>>, vector<2x32x64xf32>
    %1 = tpu.transpose %0, [0, 2, 1] : vector<2x32x64xf32> -> vector<2x64x32xf32>
    %2 = vector.shape_cast %1 : vector<2x64x32xf32> to vector<128x32xf32>
    %c0_2 = arith.constant 0 : index
    %c0_3 = arith.constant 0 : index
    %3 = vector.load %arg1[%c0_2, %c0_3] : memref<64x48xf32, #tpu.memory_space<vmem>>, vector<32x48xf32>
    %c32 = arith.constant 32 : index
    %c0_4 = arith.constant 0 : index
    %4 = vector.load %arg1[%c32, %c0_4] : memref<64x48xf32, #tpu.memory_space<vmem>>, vector<16x32xf32>
    %c48 = arith.constant 48 : index
    %c0_5 = arith.constant 0 : index
    %5 = vector.load %arg1[%c48, %c0_5] : memref<64x48xf32, #tpu.memory_space<vmem>>, vector<1x48xf32>
    %c56 = arith.constant 56 : index
    %c0_6 = arith.constant 0 : index
    %6 = vector.load %arg1[%c56, %c0_6] : memref<64x48xf32, #tpu.memory_space<vmem>>, vector<1x32xf32>
    %cst = arith.constant dense<0.000000e+00> : vector<128x48xf32>
    %7 = tpu.matmul %2, %3, %cst {dimension_numbers = #tpu.dot_dimension_numbers<[1], [0], [0], [1], [0, 0, 1, 1], [], []>} : vector<128x32xf32>, vector<32x48xf32>, vector<128x48xf32> -> vector<128x48xf32>
    %8 = vector.broadcast %5 : vector<1x48xf32> to vector<128x48xf32>
    %9 = arith.addf %7, %8 : vector<128x48xf32>
    %10 = vector.shape_cast %9 : vector<128x48xf32> to vector<2x64x48xf32>
    %11 = vector.extract_strided_slice %10 {offsets = [0, 0, 0], sizes = [2, 64, 16], strides = [1, 1, 1]} : vector<2x64x48xf32> to vector<2x64x16xf32>
    %12 = vector.extract_strided_slice %10 {offsets = [0, 0, 16], sizes = [2, 64, 16], strides = [1, 1, 1]} : vector<2x64x48xf32> to vector<2x64x16xf32>
    %13 = vector.extract_strided_slice %10 {offsets = [0, 0, 32], sizes = [2, 64, 16], strides = [1, 1, 1]} : vector<2x64x48xf32> to vector<2x64x16xf32>
    "tpu.trace_start"() <{level = 10 : i32, message = "bqc,bkc->bqk"}> : () -> ()
    %cst_7 = arith.constant dense<0.000000e+00> : vector<2x64x64xf32>
    %14 = tpu.matmul %11, %12, %cst_7 {dimension_numbers = #tpu.dot_dimension_numbers<[2], [2], [1], [1], [0, 0, 0, 1, 1, 1], [0], [0]>} : vector<2x64x16xf32>, vector<2x64x16xf32>, vector<2x64x64xf32> -> vector<2x64x64xf32>
    "tpu.trace_stop"() : () -> ()
    %cst_8 = arith.constant dense<0xFF800000> : vector<2x64xf32>
    %15 = vector.multi_reduction <maximumf>, %14, %cst_8 [2] : vector<2x64x64xf32> to vector<2x64xf32>
    %16 = vector.shape_cast %15 : vector<2x64xf32> to vector<2x64x1xf32>
    %17 = vector.broadcast %16 : vector<2x64x1xf32> to vector<2x64x64xf32>
    %18 = arith.subf %14, %17 : vector<2x64x64xf32>
    %19 = math.exp %18 : vector<2x64x64xf32>
    %cst_9 = arith.constant dense<0.000000e+00> : vector<2x64xf32>
    %20 = vector.multi_reduction <add>, %19, %cst_9 [2] : vector<2x64x64xf32> to vector<2x64xf32>
    %21 = vector.shape_cast %20 : vector<2x64xf32> to vector<2x64x1xf32>
    %22 = tpu.reciprocal %21 : vector<2x64x1xf32> -> vector<2x64x1xf32>
    %23 = vector.broadcast %22 : vector<2x64x1xf32> to vector<2x64x64xf32>
    %24 = arith.mulf %19, %23 : vector<2x64x64xf32>
    "tpu.trace_start"() <{level = 10 : i32, message = "bqk,bkc->bqc"}> : () -> ()
    %cst_10 = arith.constant dense<0.000000e+00> : vector<2x64x16xf32>
    %25 = tpu.matmul %24, %13, %cst_10 {dimension_numbers = #tpu.dot_dimension_numbers<[2], [1], [1], [2], [0, 0, 0, 1, 1, 2], [0], [0]>} : vector<2x64x64xf32>, vector<2x64x16xf32>, vector<2x64x16xf32> -> vector<2x64x16xf32>
    "tpu.trace_stop"() : () -> ()
    %26 = vector.shape_cast %25 : vector<2x64x16xf32> to vector<128x16xf32>
    %cst_11 = arith.constant dense<0.000000e+00> : vector<128x32xf32>
    %27 = tpu.matmul %26, %4, %cst_11 {dimension_numbers = #tpu.dot_dimension_numbers<[1], [0], [0], [1], [0, 0, 1, 1], [], []>} : vector<128x16xf32>, vector<16x32xf32>, vector<128x32xf32> -> vector<128x32xf32>
    %28 = vector.broadcast %6 : vector<1x32xf32> to vector<128x32xf32>
    %29 = arith.addf %27, %28 : vector<128x32xf32>
    %30 = vector.shape_cast %29 : vector<128x32xf32> to vector<2x64x32xf32>
    %31 = arith.addf %1, %30 : vector<2x64x32xf32>
    %32 = vector.extract_strided_slice %31 {offsets = [0, 0, 0], sizes = [1, 64, 32], strides = [1, 1, 1]} : vector<2x64x32xf32> to vector<1x64x32xf32>
    %33 = vector.shape_cast %32 : vector<1x64x32xf32> to vector<64x32xf32>
    %c0_12 = arith.constant 0 : index
    %c0_13 = arith.constant 0 : index
    %34 = vector.load %arg2[%c0_12, %c0_13] : memref<64x64xf32, #tpu.memory_space<vmem>>, vector<64x32xf32>
    tpu.vector_store %arg2[%c0_12, %c0_13], %33 {strides = array<i32>} : memref<64x64xf32, #tpu.memory_space<vmem>>, vector<64x32xf32>,
    %35 = vector.extract_strided_slice %31 {offsets = [1, 0, 0], sizes = [1, 64, 32], strides = [1, 1, 1]} : vector<2x64x32xf32> to vector<1x64x32xf32>
    %36 = vector.shape_cast %35 : vector<1x64x32xf32> to vector<64x32xf32>
    %c0_14 = arith.constant 0 : index
    %c32_15 = arith.constant 32 : index
    %37 = vector.load %arg2[%c0_14, %c32_15] : memref<64x64xf32, #tpu.memory_space<vmem>>, vector<64x32xf32>
    tpu.vector_store %arg2[%c0_14, %c32_15], %36 {strides = array<i32>} : memref<64x64xf32, #tpu.memory_space<vmem>>, vector<64x32xf32>,
    return
  }
}

</mosaic_0001>

<bundles_post_ra>
// kernel: tpu_custom_call.1
= control target key start
LH: loop header
LB: loop body
LE: loop exit
PB: predicated region body
PF: predicated region fallthrough
CT: control target
= control target key end

     0   :  { %s1885_s0 = inlined_call_operand.vmem [shape: f32[2,32,64], index: 0, kind: input, shape index: {}]   ;;  %s1886_s1 = inlined_call_operand.vmem [shape: f32[64,48], index: 1, kind: input, shape index: {}]   ;;  %s1887_s2 = inlined_call_operand.hbm [shape: f32[64,64], index: 2, kind: output, shape index: {}]  }
   0x1   :  { %v12_v0 = vld [vmem:[%s1885_s0] sm:$0xff]  ;;  %v87_v2 = vld [vmem:[%s1886_s1 + $0x18] sm:$0xff]  ;;  %v86_v3 = vld [vmem:[%s1886_s1 + $0x10] sm:$0xff] }
   0x2   :  { %20 = vxpose.xlu0.b32.start [1/4] (short) (narrow) %v12_v0, 64  ;;  %v16_v1 = vld [vmem:[%s1885_s0 + $0x20] sm:$0xff]  ;;  %154 = vmatpush.msra.mxu0 %v87_v2  ;;  %v85_v4 = vld [vmem:[%s1886_s1 + $0x8] sm:$0xff] }
   0x3   :  { %52 = vxpose.xlu1.b32.start [1/4] (short) (narrow) %v16_v1, 64 }
   0x4   :  { %7 = vsyncpa [#allocation3], 0  ;;  %155 = vmatpush.msra.mxu0 %v86_v3  ;;  %v13_v5 = vld [vmem:[%s1885_s0 + $0x8] sm:$0xff]  ;;  %v84_v6 = vld [vmem:[%s1886_s1] sm:$0xff]  ;;  %vm93_vm0 = vcmask 261120   ;;  %s1381_s6 = smov 112  }
   0x5   :  { %v17_v7 = vld [vmem:[%s1885_s0 + $0x28] sm:$0xff]  ;;  %v14_v8 = vld [vmem:[%s1885_s0 + $0x10] sm:$0xff]  ;;  %v15_v10 = vld [vmem:[%s1885_s0 + $0x18] sm:$0xff]  ;;  %s1382_s7 = smov 96   ;;  %vm231_vm1 = vcmask 130048   ;;  %vm402_vm2 = vcmask 523264  }
   0x6   :  { %156 = vmatpush.msra.mxu0 %v85_v4  ;;  %v18_v9 = vld [vmem:[%s1885_s0 + $0x30] sm:$0xff]  ;;  %v19_v11 = vld [vmem:[%s1885_s0 + $0x38] sm:$0xff]  ;;  %s1384_s14 = smov [#allocation2]   ;;  %s1150_s18 = sshll.u32 %s1887_s2, 4  ;;  %s1151_s18 = int_to_ptr.hbm [resolvable:$true] %s1150_s18 }
   0x7   :  { %v1289_v30 = vld [vmem:[%s1886_s1 + $0x30] ss:$0 sm:$0xff]  ;;  %s1148_s15 = sshll.u32 %s1384_s14, 4  ;;  %s1385_s19 = smov 128   ;;  %s1149_s15 = int_to_ptr.vmem [resolvable:$true] %s1148_s15 }
   0x8   :  { %157 = vmatpush.msra.mxu0 %v84_v6  ;;  %s1386_s20 = smov 8  }
   0xa   :  { %21 = vxpose.xlu0.b32.cont [2/4] (short) (narrow) %v13_v5, 64 }
   0xb   :  { %53 = vxpose.xlu1.b32.cont [2/4] (short) (narrow) %v17_v7, 64 }
  0x12   :  { %22 = vxpose.xlu0.b32.cont [3/4] (short) (narrow) %v14_v8, 64 }
  0x13   :  { %54 = vxpose.xlu1.b32.cont [3/4] (short) (narrow) %v18_v9, 64 }
  0x1a   :  { %23 = vxpose.xlu0.b32.end [4/4] (short) (narrow) %v15_v10, 64 }
  0x1b   :  { %55 = vxpose.xlu1.b32.end [4/4] (short) (narrow) %v19_v11, 64 }
  0xa6   :  { %v1438_v12 = vpop.trf.xlu0 }
  0xa7   :  { %1162 = vmatmul.msk.f32.vlgmr.msra.gmra.mxu0 %vm93_vm0, %v1438_v12  ;;  %v1464_v19 = vpop.trf.xlu1 }
  0xae   :  { %v1442_v13 = vpop.trf.xlu0 }
  0xaf   :  { %1163 = vmatmul.msk.f32.gmra.mxu0 %vm93_vm0, %v1442_v13  ;;  %v1472_v21 = vpop.trf.xlu1 }
  0xb6   :  { %v1446_v14 = vpop.trf.xlu0 }
  0xb7   :  { %1164 = vmatmul.msk.f32.gmra.mxu0 %vm93_vm0, %v1446_v14  ;;  %v1476_v22 = vpop.trf.xlu1 }
  0xbe   :  { %v1450_v15 = vpop.trf.xlu0 }
  0xbf   :  { %1165 = vmatmul.msk.f32.gmra.mxu0 %vm93_vm0, %v1450_v15  ;;  %v1480_v23 = vpop.trf.xlu1 }
  0xc6   :  { %v1454_v16 = vpop.trf.xlu0 }
  0xc7   :  { %1166 = vmatmul.msk.f32.gmra.mxu0 %vm93_vm0, %v1454_v16  ;;  %v1484_v24 = vpop.trf.xlu1 }
  0xce   :  { %v1458_v17 = vpop.trf.xlu0 }
  0xcf   :  { %1167 = vmatmul.msk.f32.gmra.mxu0 %vm93_vm0, %v1458_v17  ;;  %v1490_v25 = vpop.trf.xlu1 }
  0xd6   :  { %v1462_v18 = vpop.trf.xlu0 }
  0xd7   :  { %1168 = vmatmul.msk.f32.gmra.mxu0 %vm93_vm0, %v1462_v18  ;;  %v1494_v26 = vpop.trf.xlu1 }
  0xde   :  { %v1468_v20 = vpop.trf.xlu0 }
  0xdf   :  { %1169 = vmatmul.msk.f32.gmra.mxu0 %vm93_vm0, %v1468_v20  ;;  %v1498_v27 = vpop.trf.xlu1 }
  0xe7   :  { %1170 = vmatmul.msk.f32.gmra.mxu0 %vm93_vm0, %v1464_v19 }
  0xef   :  { %1171 = vmatmul.msk.f32.gmra.mxu0 %vm93_vm0, %v1472_v21 }
  0xf7   :  { %1172 = vmatmul.msk.f32.gmra.mxu0 %vm93_vm0, %v1476_v22 }
  0xff   :  { %1173 = vmatmul.msk.f32.gmra.mxu0 %vm93_vm0, %v1480_v23 }
 0x107   :  { %1174 = vmatmul.msk.f32.gmra.mxu0 %vm93_vm0, %v1484_v24 }
 0x10f   :  { %1175 = vmatmul.msk.f32.gmra.mxu0 %vm93_vm0, %v1490_v25 }
 0x117   :  { %1176 = vmatmul.msk.f32.gmra.mxu0 %vm93_vm0, %v1494_v26 }
 0x11f   :  { %1177 = vmatmul.msk.f32.gmra.mxu0 %vm93_vm0, %v1498_v27 }
 0x124   :  { %v159_v28 = vpop.f32.mrf.mxu0 }
 0x125   :  { %v160_v47 = vadd.f32 %v1289_v30, %v159_v28 }
 0x12c   :  { %v162_v29 = vpop.f32.mrf.mxu0 }
 0x12d   :  { %v163_v45 = vadd.f32 %v1289_v30, %v162_v29 }
 0x12f   :  { %v1264_v49 = vpack.i.bf16 %v160_v47, %v163_v45 }
 0x134   :  { %v165_v31 = vpop.f32.mrf.mxu0 }
 0x135   :  { %v1505_v32 = vadd.f32 %v1289_v30, %v165_v31 }
 0x137   :  { %219 = vrot.lane.b32.xlu1 %v1505_v32, %s1381_s6 }
 0x13c   :  { %v168_v33 = vpop.f32.mrf.mxu0 }
 0x13d   :  { %v1509_v34 = vadd.f32 %v1289_v30, %v168_v33 }
 0x13f   :  { %221 = vrot.lane.b32.xlu0 %v1509_v34, %s1381_s6  ;;  %v1259_v44 = vpack.i.bf16 %v1505_v32, %v1509_v34 }
 0x144   :  { %v171_v35 = vpop.f32.mrf.mxu0 }
 0x145   :  { %v172_v48 = vadd.f32 %v1289_v30, %v171_v35 }
 0x14c   :  { %v174_v36 = vpop.f32.mrf.mxu0 }
 0x14d   :  { %v1524_v43 = vadd.f32 %v1289_v30, %v174_v36 }
 0x14f   :  { %v1254_v3 = vpack.i.bf16 %v172_v48, %v1524_v43 }
 0x154   :  { %v177_v37 = vpop.f32.mrf.mxu0 }
 0x155   :  { %v1513_v38 = vadd.f32 %v1289_v30, %v177_v37 }
 0x157   :  { %227 = vrot.lane.b32.xlu2 %v1513_v38, %s1381_s6 }
 0x15c   :  { %v180_v39 = vpop.f32.mrf.mxu0 }
 0x15d   :  { %v1517_v40 = vadd.f32 %v1289_v30, %v180_v39 }
 0x15f   :  { %229 = vrot.lane.b32.xlu2 %v1517_v40, %s1381_s6  ;;  %v1249_v41 = vpack.i.bf16 %v1513_v38, %v1517_v40 }
 0x161   :  { %1250 = vrot.lane.b32.xlu1 %v1249_v41, %s1382_s7 }
 0x164   :  { %v183_v42 = vpop.f32.mrf.mxu0 }
 0x165   :  { %v1564_v1 = vadd.f32 %v1289_v30, %v183_v42 }
 0x167   :  { %225 = vrot.lane.b32.xlu2 %v1524_v43, %s1381_s6 }
 0x169   :  { %1260 = vrot.lane.b32.xlu1 %v1259_v44, %s1382_s7 }
 0x16c   :  { %v186_v46 = vpop.f32.mrf.mxu0 }
 0x16d   :  { %v1559_v63 = vadd.f32 %v1289_v30, %v186_v46 }
 0x16f   :  { %223 = vrot.lane.b32.xlu2 %v172_v48, %s1381_s6 }
 0x171   :  { %1265 = vrot.lane.b32.xlu1 %v1264_v49, %s1382_s7 }
 0x174   :  { %v189_v50 = vpop.f32.mrf.mxu0 }
 0x175   :  { %v1555_v61 = vadd.f32 %v1289_v30, %v189_v50 }
 0x177   :  { %217 = vrot.lane.b32.xlu2 %v163_v45, %s1381_s6 }
 0x17c   :  { %v192_v51 = vpop.f32.mrf.mxu0 }
 0x17d   :  { %v1551_v60 = vadd.f32 %v1289_v30, %v192_v51 }
 0x17f   :  { %215 = vrot.lane.b32.xlu2 %v160_v47, %s1381_s6 }
 0x184   :  { %v195_v52 = vpop.f32.mrf.mxu0 }
 0x185   :  { %v1535_v53 = vadd.f32 %v1289_v30, %v195_v52 }
 0x187   :  { %321 = vrot.lane.b32.xlu2 %v1535_v53, %s1381_s6 }
 0x18c   :  { %v198_v54 = vpop.f32.mrf.mxu0 }
 0x18d   :  { %v1539_v55 = vadd.f32 %v1289_v30, %v198_v54 }
 0x18f   :  { %323 = vrot.lane.b32.xlu2 %v1539_v55, %s1381_s6 }
 0x194   :  { %v201_v56 = vpop.f32.mrf.mxu0 }
 0x195   :  { %v1543_v57 = vadd.f32 %v1289_v30, %v201_v56 }
 0x197   :  { %325 = vrot.lane.b32.xlu2 %v1543_v57, %s1381_s6 }
 0x19c   :  { %v204_v58 = vpop.f32.mrf.mxu0 }
 0x19d   :  { %v1547_v59 = vadd.f32 %v1289_v30, %v204_v58 }
 0x19f   :  { %327 = vrot.lane.b32.xlu2 %v1547_v59, %s1381_s6 }
 0x1a7   :  { %319 = vrot.lane.b32.xlu2 %v1551_v60, %s1381_s6 }
 0x1a9   :  { %v220_v5 = vpop.permute.xlu1 %219 }
 0x1af   :  { %317 = vrot.lane.b32.xlu2 %v1555_v61, %s1381_s6 }
 0x1b1   :  { %v228_v62 = vpop.permute.xlu2 %227  ;;  %v222_v6 = vpop.permute.xlu0 %221 }
 0x1b7   :  { %315 = vrot.lane.b32.xlu2 %v1559_v63, %s1381_s6 }
 0x1b9   :  { %v230_v0 = vpop.permute.xlu2 %229 }
 0x1ba   :  { %1178 = vmatpush.xpose.msk.msra.mxu2 %vm231_vm1, %v230_v0 }
 0x1be   :  { %1179 = vmatpush.xpose.msk.msra.mxu2 %vm231_vm1, %v228_v62 }
 0x1bf   :  { %313 = vrot.lane.b32.xlu2 %v1564_v1, %s1381_s6 }
 0x1c1   :  { %v226_v2 = vpop.permute.xlu2 %225 }
 0x1c2   :  { %1180 = vmatpush.xpose.msk.msra.mxu2 %vm231_vm1, %v226_v2 }
 0x1c7   :  { %1255 = vrot.lane.b32.xlu2 %v1254_v3, %s1382_s7 }
 0x1c9   :  { %v224_v4 = vpop.permute.xlu2 %223 }
 0x1ca   :  { %1181 = vmatpush.xpose.msk.msra.mxu2 %vm231_vm1, %v224_v4 }
 0x1ce   :  { %1182 = vmatpush.xpose.msk.msra.mxu2 %vm231_vm1, %v222_v6 }
 0x1d1   :  { %v218_v7 = vpop.permute.xlu2 %217 }
 0x1d2   :  { %1183 = vmatpush.xpose.msk.msra.mxu2 %vm231_vm1, %v220_v5 }
 0x1d3   :  { %v1251_v8 = vpop.permute.xlu1 %1250 }
 0x1d4   :  { %v1252_v9 = vunpack.i.l.bf16 %v1251_v8  ;;  %v1253_v10 = vunpack.i.h.bf16 %v1251_v8 }
 0x1d6   :  { %1184 = vmatpush.xpose.msk.msra.mxu2 %vm231_vm1, %v218_v7  ;;  %843 = vmatpush.msra.mxu3 %v1252_v9 }
 0x1d8   :  { %844 = vmatpush.msra.mxu3 %v1253_v10 }
 0x1d9   :  { %v216_v11 = vpop.permute.xlu2 %215 }
 0x1da   :  { %1185 = vmatpush.xpose.msk.msra.mxu2 %vm231_vm1, %v216_v11 }
 0x1db   :  { %v1261_v36 = vpop.permute.xlu1 %1260 }
 0x1dd   :  { %1186 = vmatmul.msk.f32.vlgmr.msra.gmra.mxu2 %vm231_vm1, %v160_v47 }
 0x1e1   :  { %v322_v28 = vpop.permute.xlu2 %321 }
 0x1e3   :  { %v1266_v42 = vpop.permute.xlu1 %1265 }
 0x1e4   :  { %v1268_v44 = vunpack.i.h.bf16 %v1266_v42 }
 0x1e5   :  { %1187 = vmatmul.msk.f32.gmra.mxu2 %vm231_vm1, %v163_v45 }
 0x1e9   :  { %v324_v29 = vpop.permute.xlu2 %323 }
 0x1ed   :  { %1188 = vmatmul.msk.f32.gmra.mxu2 %vm231_vm1, %v1505_v32 }
 0x1f1   :  { %v326_v30 = vpop.permute.xlu2 %325 }
 0x1f5   :  { %1189 = vmatmul.msk.f32.gmra.mxu2 %vm231_vm1, %v1509_v34 }
 0x1f9   :  { %v328_v31 = vpop.permute.xlu2 %327 }
 0x1fa   :  { %1194 = vmatpush.xpose.msk.msrb.mxu2 %vm231_vm1, %v328_v31 }
 0x1fd   :  { %1190 = vmatmul.msk.f32.gmra.mxu2 %vm231_vm1, %v172_v48 }
 0x1fe   :  { %1195 = vmatpush.xpose.msk.msrb.mxu2 %vm231_vm1, %v326_v30 }
 0x201   :  { %v320_v33 = vpop.permute.xlu2 %319 }
 0x202   :  { %1196 = vmatpush.xpose.msk.msrb.mxu2 %vm231_vm1, %v324_v29 }
 0x205   :  { %1191 = vmatmul.msk.f32.gmra.mxu2 %vm231_vm1, %v1524_v43  ;;  %v1263_v43 = vunpack.i.h.bf16 %v1261_v36 }
 0x206   :  { %1197 = vmatpush.xpose.msk.msrb.mxu2 %vm231_vm1, %v322_v28 }
 0x209   :  { %v318_v32 = vpop.permute.xlu2 %317 }
 0x20a   :  { %1198 = vmatpush.xpose.msk.msrb.mxu2 %vm231_vm1, %v320_v33 }
 0x20d   :  { %1192 = vmatmul.msk.f32.gmra.mxu2 %vm231_vm1, %v1513_v38  ;;  %v1262_v38 = vunpack.i.l.bf16 %v1261_v36 }
 0x20e   :  { %1199 = vmatpush.xpose.msk.msrb.mxu2 %vm231_vm1, %v318_v32 }
 0x211   :  { %v316_v34 = vpop.permute.xlu2 %315 }
 0x212   :  { %1200 = vmatpush.xpose.msk.msrb.mxu2 %vm231_vm1, %v316_v34 }
 0x215   :  { %1193 = vmatmul.msk.f32.gmra.mxu2 %vm231_vm1, %v1517_v40  ;;  %v1267_v40 = vunpack.i.l.bf16 %v1266_v42 }
 0x219   :  { %v314_v35 = vpop.permute.xlu2 %313 }
 0x21a   :  { %1201 = vmatpush.xpose.msk.msrb.mxu2 %vm231_vm1, %v314_v35 }
 0x21d   :  { %1202 = vmatmul.msk.f32.vlgmr.msrb.gmra.mxu2 %vm231_vm1, %v1564_v1 }
 0x221   :  { %v1256_v37 = vpop.permute.xlu2 %1255 }
 0x222   :  { %v1257_v39 = vunpack.i.l.bf16 %v1256_v37  ;;  %v1258_v41 = vunpack.i.h.bf16 %v1256_v37 }
 0x224   :  { %845 = vmatpush.msra.mxu3 %v1257_v39 }
 0x225   :  { %1203 = vmatmul.msk.f32.gmra.mxu2 %vm231_vm1, %v1559_v63 }
 0x226   :  { %846 = vmatpush.msra.mxu3 %v1258_v41 }
 0x228   :  { %847 = vmatpush.msra.mxu3 %v1262_v38 }
 0x22a   :  { %848 = vmatpush.msra.mxu3 %v1263_v43 }
 0x22c   :  { %849 = vmatpush.msra.mxu3 %v1267_v40 }
 0x22d   :  { %1204 = vmatmul.msk.f32.gmra.mxu2 %vm231_vm1, %v1555_v61 }
 0x22e   :  { %850 = vmatpush.msra.mxu3 %v1268_v44 }
 0x235   :  { %1205 = vmatmul.msk.f32.gmra.mxu2 %vm231_vm1, %v1551_v60 }
 0x23d   :  { %1206 = vmatmul.msk.f32.gmra.mxu2 %vm231_vm1, %v1535_v53 }
 0x245   :  { %1207 = vmatmul.msk.f32.gmra.mxu2 %vm231_vm1, %v1539_v55 }
 0x24d   :  { %1208 = vmatmul.msk.f32.gmra.mxu2 %vm231_vm1, %v1543_v57 }
 0x255   :  { %1209 = vmatmul.msk.f32.gmra.mxu2 %vm231_vm1, %v1547_v59 }
 0x260   :  { %v281_v45 = vpop.f32.mrf.mxu2 }
 0x261   :  { %v403_v46 = vsel %vm402_vm2, %v281_v45, -inf }
 0x262   :  { %404 = vmax.xlane.f32.xlu2 %v403_v46 }
 0x268   :  { %v284_v47 = vpop.f32.mrf.mxu2 }
 0x269   :  { %v406_v48 = vsel %vm402_vm2, %v284_v47, -inf }
 0x26a   :  { %407 = vmax.xlane.f32.xlu2 %v406_v48 }
 0x270   :  { %v287_v49 = vpop.f32.mrf.mxu2 }
 0x271   :  { %v409_v50 = vsel %vm402_vm2, %v287_v49, -inf }
 0x272   :  { %410 = vmax.xlane.f32.xlu1 %v409_v50 }
 0x278   :  { %v290_v51 = vpop.f32.mrf.mxu2 }
 0x279   :  { %v412_v52 = vsel %vm402_vm2, %v290_v51, -inf }
 0x27a   :  { %413 = vmax.xlane.f32.xlu2 %v412_v52 }
 0x280   :  { %v1618_v54 = vpop.f32.mrf.mxu2 }
 0x281   :  { %v415_v56 = vsel %vm402_vm2, %v1618_v54, -inf }
 0x282   :  { %416 = vmax.xlane.f32.xlu2 %v415_v56 }
 0x288   :  { %v1622_v58 = vpop.f32.mrf.mxu2 }
 0x289   :  { %v418_v62 = vsel %vm402_vm2, %v1622_v58, -inf }
 0x28a   :  { %419 = vmax.xlane.f32.xlu0 %v418_v62 }
 0x290   :  { %v1626_v0 = vpop.f32.mrf.mxu2 }
 0x291   :  { %v421_v2 = vsel %vm402_vm2, %v1626_v0, -inf }
 0x292   :  { %422 = vmax.xlane.f32.xlu2 %v421_v2 }
 0x298   :  { %v1630_v3 = vpop.f32.mrf.mxu2 }
 0x299   :  { %v424_v4 = vsel %vm402_vm2, %v1630_v3, -inf }
 0x29a   :  { %425 = vmax.xlane.f32.xlu2 %v424_v4 }
 0x2a0   :  { %v1634_v5 = vpop.f32.mrf.mxu2 }
 0x2a1   :  { %v427_v6 = vsel %vm402_vm2, %v1634_v5, -inf }
 0x2a2   :  { %428 = vmax.xlane.f32.xlu0 %v427_v6  ;;  %v1274_v6 = vpack.i.bf16 %v1535_v53, %v1539_v55 }
 0x2a8   :  { %v1638_v7 = vpop.f32.mrf.mxu2 }
 0x2a9   :  { %v430_v8 = vsel %vm402_vm2, %v1638_v7, -inf }
 0x2aa   :  { %431 = vmax.xlane.f32.xlu0 %v430_v8 }
 0x2b0   :  { %v1642_v9 = vpop.f32.mrf.mxu2 }
 0x2b1   :  { %v433_v10 = vsel %vm402_vm2, %v1642_v9, -inf }
 0x2b2   :  { %434 = vmax.xlane.f32.xlu1 %v433_v10 }
 0x2b8   :  { %v1646_v11 = vpop.f32.mrf.mxu2 }
 0x2b9   :  { %v436_v28 = vsel %vm402_vm2, %v1646_v11, -inf }
 0x2ba   :  { %437 = vmax.xlane.f32.xlu0 %v436_v28 }
 0x2c0   :  { %v1650_v29 = vpop.f32.mrf.mxu2 }
 0x2c1   :  { %v439_v30 = vsel %vm402_vm2, %v1650_v29, -inf }
 0x2c2   :  { %440 = vmax.xlane.f32.xlu0 %v439_v30 }
 0x2c8   :  { %v1654_v31 = vpop.f32.mrf.mxu2 }
 0x2c9   :  { %v442_v33 = vsel %vm402_vm2, %v1654_v31, -inf }
 0x2ca   :  { %443 = vmax.xlane.f32.xlu2 %v442_v33 }
 0x2d0   :  { %v1658_v32 = vpop.f32.mrf.mxu2 }
 0x2d1   :  { %v445_v34 = vsel %vm402_vm2, %v1658_v32, -inf }
 0x2d2   :  { %446 = vmax.xlane.f32.xlu0 %v445_v34 }
 0x2d5   :  { %v405_v35 = vpop.xlane.xlu2 %404 }
 0x2d6   :  { %v451_v36 = vsub.f32 %v281_v45, %v405_v35 }
 0x2d8   :  { %v467_v37 = vmul.f32 1.442695, %v451_v36  ;;  %v1662_v39 = vpop.f32.mrf.mxu2 }
 0x2d9   :  { %v448_v41 = vsel %vm402_vm2, %v1662_v39, -inf }
 0x2da   :  { %1291 = vpow2.f32 %v467_v37  ;;  %449 = vmax.xlane.f32.xlu1 %v448_v41 }
 0x2dd   :  { %v408_v38 = vpop.xlane.xlu2 %407 }
 0x2de   :  { %v452_v42 = vsub.f32 %v284_v47, %v408_v38 }
 0x2e0   :  { %v1666_v43 = vpop.eup %1291  ;;  %v469_v40 = vmul.f32 1.442695, %v452_v42 }
 0x2e1   :  { %v499_v44 = vsel %vm402_vm2, %v1666_v43, 0.0 }
 0x2e2   :  { %1293 = vpow2.f32 %v469_v40  ;;  %500 = vadd.xlane.f32.xlu2 %v499_v44 }
 0x2e5   :  { %v411_v46 = vpop.xlane.xlu1 %410 }
 0x2e6   :  { %v453_v45 = vsub.f32 %v287_v49, %v411_v46 }
 0x2e8   :  { %v1670_v48 = vpop.eup %1293  ;;  %v471_v50 = vmul.f32 1.442695, %v453_v45 }
 0x2e9   :  { %v502_v52 = vsel %vm402_vm2, %v1670_v48, 0.0 }
 0x2ea   :  { %1295 = vpow2.f32 %v471_v50  ;;  %503 = vadd.xlane.f32.xlu2 %v502_v52 }
 0x2ed   :  { %v414_v56 = vpop.xlane.xlu2 %413 }
 0x2ee   :  { %v454_v47 = vsub.f32 %v290_v51, %v414_v56 }
 0x2f0   :  { %v1674_v62 = vpop.eup %1295  ;;  %v473_v2 = vmul.f32 1.442695, %v454_v47 }
 0x2f1   :  { %v505_v4 = vsel %vm402_vm2, %v1674_v62, 0.0 }
 0x2f2   :  { %1297 = vpow2.f32 %v473_v2  ;;  %506 = vadd.xlane.f32.xlu0 %v505_v4 }
 0x2f3   :  { %1275 = vrot.lane.b32.xlu1 %v1274_v6, %s1382_s7 }
 0x2f5   :  { %v417_v49 = vpop.xlane.xlu2 %416 }
 0x2f6   :  { %v455_v8 = vsub.f32 %v1618_v54, %v417_v49 }
 0x2f8   :  { %v1682_v10 = vpop.eup %1297  ;;  %v475_v28 = vmul.f32 1.442695, %v455_v8 }
 0x2f9   :  { %v508_v51 = vsel %vm402_vm2, %v1682_v10, 0.0 }
 0x2fa   :  { %1299 = vpow2.f32 %v475_v28  ;;  %509 = vadd.xlane.f32.xlu2 %v508_v51 }
 0x2fd   :  { %v420_v30 = vpop.xlane.xlu0 %419 }
 0x2fe   :  { %v456_v33 = vsub.f32 %v1622_v58, %v420_v30 }
 0x300   :  { %v1687_v34 = vpop.eup %1299  ;;  %v477_v53 = vmul.f32 1.442695, %v456_v33 }
 0x301   :  { %v511_v55 = vsel %vm402_vm2, %v1687_v34, 0.0 }
 0x302   :  { %1301 = vpow2.f32 %v477_v53  ;;  %512 = vadd.xlane.f32.xlu0 %v511_v55 }
 0x305   :  { %v423_v54 = vpop.xlane.xlu2 %422 }
 0x306   :  { %v457_v35 = vsub.f32 %v1626_v0, %v423_v54 }
 0x308   :  { %v1692_v36 = vpop.eup %1301  ;;  %v479_v37 = vmul.f32 1.442695, %v457_v35 }
 0x309   :  { %v514_v41 = vsel %vm402_vm2, %v1692_v36, 0.0 }
 0x30a   :  { %1303 = vpow2.f32 %v479_v37  ;;  %515 = vadd.xlane.f32.xlu0 %v514_v41 }
 0x30d   :  { %v426_v58 = vpop.xlane.xlu2 %425 }
 0x30e   :  { %v458_v38 = vsub.f32 %v1630_v3, %v426_v58 }
 0x310   :  { %v1697_v42 = vpop.eup %1303  ;;  %v481_v40 = vmul.f32 1.442695, %v458_v38 }
 0x311   :  { %v517_v44 = vsel %vm402_vm2, %v1697_v42, 0.0 }
 0x312   :  { %518 = vadd.xlane.f32.xlu0 %v517_v44  ;;  %1305 = vpow2.f32 %v481_v40 }
 0x315   :  { %v429_v0 = vpop.xlane.xlu0 %428 }
 0x316   :  { %v459_v46 = vsub.f32 %v1634_v5, %v429_v0  ;;  %v1269_v5 = vpack.i.bf16 %v1543_v57, %v1547_v59  ;;  %v1279_v57 = vpack.i.bf16 %v1555_v61, %v1551_v60 }
 0x318   :  { %v483_v45 = vmul.f32 1.442695, %v459_v46  ;;  %v1702_v50 = vpop.eup %1305 }
 0x319   :  { %v520_v52 = vsel %vm402_vm2, %v1702_v50, 0.0 }
 0x31a   :  { %1307 = vpow2.f32 %v483_v45 }
 0x31d   :  { %v432_v56 = vpop.xlane.xlu0 %431  ;;  %521 = vadd.xlane.f32.xlu1 %v520_v52 }
 0x31e   :  { %v460_v3 = vsub.f32 %v1638_v7, %v432_v56  ;;  %v1284_v7 = vpack.i.bf16 %v1564_v1, %v1559_v63 }
 0x320   :  { %v1707_v47 = vpop.eup %1307  ;;  %v485_v2 = vmul.f32 1.442695, %v460_v3 }
 0x321   :  { %v523_v4 = vsel %vm402_vm2, %v1707_v47, 0.0 }
 0x322   :  { %1309 = vpow2.f32 %v485_v2  ;;  %524 = vadd.xlane.f32.xlu2 %v523_v4 }
 0x325   :  { %v435_v28 = vpop.xlane.xlu1 %434 }
 0x326   :  { %1270 = vrot.lane.b32.xlu0 %v1269_v5, %s1382_s7  ;;  %v461_v51 = vsub.f32 %v1642_v9, %v435_v28 }
 0x328   :  { %v1714_v6 = vpop.eup %1309  ;;  %v487_v59 = vmul.f32 1.442695, %v461_v51 }
 0x329   :  { %v526_v49 = vsel %vm402_vm2, %v1714_v6, 0.0 }
 0x32a   :  { %527 = vadd.xlane.f32.xlu2 %v526_v49  ;;  %1311 = vpow2.f32 %v487_v59 }
 0x32d   :  { %v438_v8 = vpop.xlane.xlu0 %437 }
 0x330   :  { %v1726_v63 = vpop.eup %1311 }
 0x331   :  { %v529_v60 = vsel %vm402_vm2, %v1726_v63, 0.0 }
 0x335   :  { %v441_v30 = vpop.xlane.xlu0 %440 }
 0x336   :  { %1285 = vrot.lane.b32.xlu1 %v1284_v7, %s1382_s7  ;;  %v463_v1 = vsub.f32 %v1650_v29, %v441_v30  ;;  %v462_v29 = vsub.f32 %v1646_v11, %v438_v8 }
 0x338   :  { %v491_v61 = vmul.f32 1.442695, %v463_v1  ;;  %v489_v40 = vmul.f32 1.442695, %v462_v29 }
 0x33d   :  { %v444_v33 = vpop.xlane.xlu2 %443 }
 0x33e   :  { %v464_v53 = vsub.f32 %v1654_v31, %v444_v33 }
 0x340   :  { %v493_v55 = vmul.f32 1.442695, %v464_v53 }
 0x342   :  { %1280 = vrot.lane.b32.xlu2 %v1279_v57, %s1382_s7  ;;  %1313 = vpow2.f32 %v493_v55 }
 0x343   :  { %1315 = vpow2.f32 %v491_v61 }
 0x345   :  { %v447_v54 = vpop.xlane.xlu0 %446 }
 0x346   :  { %v465_v35 = vsub.f32 %v1658_v32, %v447_v54 }
 0x348   :  { %v495_v9 = vmul.f32 1.442695, %v465_v35  ;;  %v1732_v37 = vpop.eup %1313 }
 0x349   :  { %v538_v41 = vsel %vm402_vm2, %v1732_v37, 0.0  ;;  %v1737_v32 = vpop.eup %1315 }
 0x34a   :  { %1317 = vpow2.f32 %v495_v9  ;;  %v535_v56 = vsel %vm402_vm2, %v1737_v32, 0.0 }
 0x34d   :  { %v450_v46 = vpop.xlane.xlu1 %449 }
 0x34e   :  { %v466_v3 = vsub.f32 %v1662_v39, %v450_v46 }
 0x350   :  { %530 = vadd.xlane.f32.xlu0 %v529_v60  ;;  %v1739_v58 = vpop.eup %1317  ;;  %v497_v8 = vmul.f32 1.442695, %v466_v3 }
 0x351   :  { %v541_v52 = vsel %vm402_vm2, %v1739_v58, 0.0 }
 0x355   :  { %v501_v31 = vpop.xlane.xlu2 %500 }
 0x356   :  { %1319 = vrcp.f32 %v501_v31  ;;  %v558_v11 = vand.u32 2147483648, %v501_v31  ;;  %v556_v4 = vand.u32 2147483647, %v501_v31  ;;  %vm552_vm4 = vweird.f32 %v501_v31 }
 0x358   :  { %539 = vadd.xlane.f32.xlu0 %v538_v41  ;;  %v559_v7 = vor.u32 1.1754944e-38, %v558_v11  ;;  %vm557_vm6 = vcmp.eq.f32.partialorder %v556_v4, 8.507059e+37 }
 0x35c   :  { %v1320_v38 = vpop.eup %1319 }
 0x35d   :  { %v548_v44 = vmul.f32 %v1320_v38, %v501_v31  ;;  %v504_v0 = vpop.xlane.xlu2 %503  ;;  %vm553_vm3 = vweird.f32 %v1320_v38 }
 0x35e   :  { %1321 = vrcp.f32 %v504_v0  ;;  %vm554_vm5 = vmor %vm552_vm4, %vm553_vm3  ;;  %v572_v53 = vand.u32 2147483648, %v504_v0  ;;  %v570_v54 = vand.u32 2147483647, %v504_v0  ;;  %vm566_vm8 = vweird.f32 %v504_v0 }
 0x35f   :  { %v549_v45 = vsub.f32 1.0, %v548_v44  ;;  %1323 = vpow2.f32 %v489_v40 }
 0x360   :  { %542 = vadd.xlane.f32.xlu0 %v541_v52  ;;  %536 = vadd.xlane.f32.xlu1 %v535_v56  ;;  %v573_v61 = vor.u32 1.1754944e-38, %v572_v53  ;;  %vm571_vm10 = vcmp.eq.f32.partialorder %v570_v54, 8.507059e+37 }
 0x361   :  { %v550_v2 = vmul.f32 %v1320_v38, %v549_v45 }
 0x363   :  { %v551_v5 = vadd.f32 %v1320_v38, %v550_v2 }
 0x364   :  { %v1322_v49 = vpop.eup %1321 }
 0x365   :  { %v562_v28 = vmul.f32 %v1322_v49, %v504_v0  ;;  %v507_v51 = vpop.xlane.xlu0 %506  ;;  %v555_v57 = vsel %vm554_vm5, %v1320_v38, %v551_v5  ;;  %v1746_v59 = vpop.eup %1323  ;;  %vm567_vm7 = vweird.f32 %v1322_v49 }
 0x366   :  { %1325 = vrcp.f32 %v507_v51  ;;  %v560_v30 = vsel %vm557_vm6, %v559_v7, %v555_v57  ;;  %v532_v1 = vsel %vm402_vm2, %v1746_v59, 0.0  ;;  %vm568_vm9 = vmor %vm566_vm8, %vm567_vm7  ;;  %v586_v44 = vand.u32 2147483648, %v507_v51 }
 0x367   :  { %v563_v33 = vsub.f32 1.0, %v562_v28  ;;  %v771_v39 = vmul.f32 %v1666_v43, %v560_v30  ;;  %1327 = vpow2.f32 %v497_v8  ;;  %v584_v0 = vand.u32 2147483647, %v507_v51 }
 0x368   :  { %vm580_vm12 = vweird.f32 %v507_v51  ;;  %v587_v11 = vor.u32 1.1754944e-38, %v586_v44 }
 0x369   :  { %v564_v55 = vmul.f32 %v1322_v49, %v563_v33  ;;  %1210 = vmatmul.msk.f32.vlgmr.msra.gmra.mxu3 %vm402_vm2, %v771_v39  ;;  %vm585_vm14 = vcmp.eq.f32.partialorder %v584_v0, 8.507059e+37 }
 0x36b   :  { %533 = vadd.xlane.f32.xlu2 %v532_v1  ;;  %v565_v35 = vadd.f32 %v1322_v49, %v564_v55 }
 0x36c   :  { %v1326_v60 = vpop.eup %1325 }
 0x36d   :  { %v576_v9 = vmul.f32 %v1326_v60, %v507_v51  ;;  %v510_v31 = vpop.xlane.xlu2 %509  ;;  %v569_v41 = vsel %vm568_vm9, %v1322_v49, %v565_v35  ;;  %v1752_v29 = vpop.eup %1327  ;;  %vm581_vm11 = vweird.f32 %v1326_v60 }
 0x36e   :  { %1329 = vrcp.f32 %v510_v31  ;;  %v574_v43 = vsel %vm571_vm10, %v573_v61, %v569_v41  ;;  %v544_v45 = vsel %vm402_vm2, %v1752_v29, 0.0  ;;  %vm582_vm13 = vmor %vm580_vm12, %vm581_vm11  ;;  %v600_v7 = vand.u32 2147483648, %v510_v31 }
 0x36f   :  { %v577_v38 = vsub.f32 1.0, %v576_v9  ;;  %v772_v40 = vmul.f32 %v1670_v48, %v574_v43  ;;  %v598_v28 = vand.u32 2147483647, %v510_v31  ;;  %vm594_vm3 = vweird.f32 %v510_v31 }
 0x370   :  { %v601_v30 = vor.u32 1.1754944e-38, %v600_v7 }
 0x371   :  { %v578_v46 = vmul.f32 %v1326_v60, %v577_v38  ;;  %1211 = vmatmul.msk.f32.gmra.mxu3 %vm402_vm2, %v772_v40  ;;  %vm599_vm5 = vcmp.eq.f32.partialorder %v598_v28, 8.507059e+37 }
 0x373   :  { %545 = vadd.xlane.f32.xlu2 %v544_v45  ;;  %v579_v52 = vadd.f32 %v1326_v60, %v578_v46  ;;  %v1276_v46 = vpop.permute.xlu1 %1275 }
 0x374   :  { %v1330_v56 = vpop.eup %1329 }
 0x375   :  { %v590_v3 = vmul.f32 %v1330_v56, %v510_v31  ;;  %v513_v2 = vpop.xlane.xlu0 %512  ;;  %v583_v4 = vsel %vm582_vm13, %v1326_v60, %v579_v52  ;;  %vm595_vm15 = vweird.f32 %v1330_v56 }
 0x376   :  { %1331 = vrcp.f32 %v513_v2  ;;  %v588_v48 = vsel %vm585_vm14, %v587_v11, %v583_v4  ;;  %vm596_vm4 = vmor %vm594_vm3, %vm595_vm15  ;;  %v614_v1 = vand.u32 2147483648, %v513_v2  ;;  %v612_v60 = vand.u32 2147483647, %v513_v2 }
 0x377   :  { %v591_v5 = vsub.f32 1.0, %v590_v3  ;;  %v773_v49 = vmul.f32 %v1674_v62, %v588_v48  ;;  %vm608_vm7 = vweird.f32 %v513_v2 }
 0x378   :  { %v615_v31 = vor.u32 1.1754944e-38, %v614_v1  ;;  %vm613_vm9 = vcmp.eq.f32.partialorder %v612_v60, 8.507059e+37 }
 0x379   :  { %v592_v8 = vmul.f32 %v1330_v56, %v591_v5  ;;  %1212 = vmatmul.msk.f32.gmra.mxu3 %vm402_vm2, %v773_v49 }
 0x37b   :  { %v593_v51 = vadd.f32 %v1330_v56, %v592_v8 }
 0x37c   :  { %v1332_v57 = vpop.eup %1331 }
 0x37d   :  { %v604_v33 = vmul.f32 %v1332_v57, %v513_v2  ;;  %v516_v39 = vpop.xlane.xlu0 %515  ;;  %v597_v53 = vsel %vm596_vm4, %v1330_v56, %v593_v51  ;;  %vm609_vm6 = vweird.f32 %v1332_v57 }
 0x37e   :  { %1333 = vrcp.f32 %v516_v39  ;;  %v602_v55 = vsel %vm599_vm5, %v601_v30, %v597_v53  ;;  %vm610_vm8 = vmor %vm608_vm7, %vm609_vm6  ;;  %v628_v0 = vand.u32 2147483648, %v516_v39  ;;  %v626_v52 = vand.u32 2147483647, %v516_v39 }
 0x37f   :  { %v605_v54 = vsub.f32 1.0, %v604_v33  ;;  %v774_v62 = vmul.f32 %v1682_v10, %v602_v55  ;;  %vm622_vm11 = vweird.f32 %v516_v39 }
 0x380   :  { %v629_v3 = vor.u32 1.1754944e-38, %v628_v0  ;;  %vm627_vm13 = vcmp.eq.f32.partialorder %v626_v52, 8.507059e+37 }
 0x381   :  { %v606_v35 = vmul.f32 %v1332_v57, %v605_v54  ;;  %1213 = vmatmul.msk.f32.gmra.mxu3 %vm402_vm2, %v774_v62 }
 0x383   :  { %v607_v61 = vadd.f32 %v1332_v57, %v606_v35 }
 0x384   :  { %v1334_v9 = vpop.eup %1333 }
 0x385   :  { %v618_v41 = vmul.f32 %v1334_v9, %v516_v39  ;;  %v519_v43 = vpop.xlane.xlu0 %518  ;;  %v611_v38 = vsel %vm610_vm8, %v1332_v57, %v607_v61  ;;  %vm623_vm10 = vweird.f32 %v1334_v9 }
 0x386   :  { %1335 = vrcp.f32 %v519_v43  ;;  %v616_v40 = vsel %vm613_vm9, %v615_v31, %v611_v38  ;;  %vm624_vm12 = vmor %vm622_vm11, %vm623_vm10  ;;  %v642_v8 = vand.u32 2147483648, %v519_v43  ;;  %v640_v28 = vand.u32 2147483647, %v519_v43 }
 0x387   :  { %v619_v44 = vsub.f32 1.0, %v618_v41  ;;  %v775_v10 = vmul.f32 %v1687_v34, %v616_v40  ;;  %vm636_vm15 = vweird.f32 %v519_v43  ;;  %v1277_v38 = vunpack.i.l.bf16 %v1276_v46 }
 0x388   :  { %v643_v57 = vor.u32 1.1754944e-38, %v642_v8  ;;  %vm641_vm4 = vcmp.eq.f32.partialorder %v640_v28, 8.507059e+37 }
 0x389   :  { %v620_v45 = vmul.f32 %v1334_v9, %v619_v44  ;;  %1214 = vmatmul.msk.f32.gmra.mxu3 %vm402_vm2, %v775_v10  ;;  %v1278_v10 = vunpack.i.h.bf16 %v1276_v46 }
 0x38b   :  { %v621_v56 = vadd.f32 %v1334_v9, %v620_v45 }
 0x38c   :  { %v1336_v11 = vpop.eup %1335 }
 0x38d   :  { %v632_v2 = vmul.f32 %v1336_v11, %v519_v43  ;;  %v625_v4 = vsel %vm624_vm12, %v1334_v9, %v621_v56  ;;  %vm637_vm14 = vweird.f32 %v1336_v11 }
 0x38e   :  { %v630_v48 = vsel %vm627_vm13, %v629_v3, %v625_v4  ;;  %vm638_vm3 = vmor %vm636_vm15, %vm637_vm14 }
 0x38f   :  { %v633_v5 = vsub.f32 1.0, %v632_v2  ;;  %v776_v49 = vmul.f32 %v1692_v36, %v630_v48 }
 0x390   :  { %v522_v34 = vpop.xlane.xlu1 %521 }
 0x391   :  { %v634_v7 = vmul.f32 %v1336_v11, %v633_v5  ;;  %1337 = vrcp.f32 %v522_v34  ;;  %1215 = vmatmul.msk.f32.gmra.mxu3 %vm402_vm2, %v776_v49  ;;  %v656_v35 = vand.u32 2147483648, %v522_v34  ;;  %v654_v31 = vand.u32 2147483647, %v522_v34 }
 0x392   :  { %vm650_vm6 = vweird.f32 %v522_v34 }
 0x393   :  { %v635_v51 = vadd.f32 %v1336_v11, %v634_v7  ;;  %v657_v44 = vor.u32 1.1754944e-38, %v656_v35  ;;  %vm655_vm8 = vcmp.eq.f32.partialorder %v654_v31, 8.507059e+37  ;;  %v88_v31 = vld [vmem:[%s1886_s1 + $0x20] sm:$0xff] }
 0x395   :  { %v525_v30 = vpop.xlane.xlu2 %524  ;;  %v639_v33 = vsel %vm638_vm3, %v1336_v11, %v635_v51 }
 0x396   :  { %1339 = vrcp.f32 %v525_v30  ;;  %v644_v53 = vsel %vm641_vm4, %v643_v57, %v639_v33  ;;  %v670_v2 = vand.u32 2147483648, %v525_v30  ;;  %vm664_vm10 = vweird.f32 %v525_v30 }
 0x397   :  { %v1338_v39 = vpop.eup %1337  ;;  %v777_v54 = vmul.f32 %v1697_v42, %v644_v53  ;;  %v668_v4 = vand.u32 2147483647, %v525_v30 }
 0x398   :  { %v646_v55 = vmul.f32 %v1338_v39, %v522_v34  ;;  %v1271_v36 = vpop.permute.xlu0 %1270  ;;  %vm651_vm5 = vweird.f32 %v1338_v39  ;;  %v671_v7 = vor.u32 1.1754944e-38, %v670_v2 }
 0x399   :  { %v1272_v62 = vunpack.i.l.bf16 %v1271_v36  ;;  %1216 = vmatmul.msk.f32.gmra.mxu3 %vm402_vm2, %v777_v54  ;;  %v1273_v60 = vunpack.i.h.bf16 %v1271_v36  ;;  %vm652_vm7 = vmor %vm650_vm6, %vm651_vm5  ;;  %vm669_vm12 = vcmp.eq.f32.partialorder %v668_v4, 8.507059e+37 }
 0x39a   :  { %v647_v1 = vsub.f32 1.0, %v646_v55 }
 0x39b   :  { %932 = vmatpush.msrb.mxu3 %v1272_v62 }
 0x39c   :  { %v1340_v61 = vpop.eup %1339  ;;  %v648_v9 = vmul.f32 %v1338_v39, %v647_v1 }
 0x39d   :  { %v660_v41 = vmul.f32 %v1340_v61, %v525_v30  ;;  %v528_v43 = vpop.xlane.xlu2 %527  ;;  %933 = vmatpush.msrb.mxu3 %v1273_v60  ;;  %vm665_vm9 = vweird.f32 %v1340_v61 }
 0x39e   :  { %1341 = vrcp.f32 %v528_v43  ;;  %v649_v40 = vadd.f32 %v1338_v39, %v648_v9  ;;  %vm666_vm11 = vmor %vm664_vm10, %vm665_vm9  ;;  %vm678_vm14 = vweird.f32 %v528_v43  ;;  %v682_v55 = vand.u32 2147483647, %v528_v43 }
 0x39f   :  { %v661_v42 = vsub.f32 1.0, %v660_v41  ;;  %934 = vmatpush.msrb.mxu3 %v1277_v38 }
 0x3a0   :  { %v653_v0 = vsel %vm652_vm7, %v1338_v39, %v649_v40  ;;  %v684_v39 = vand.u32 2147483648, %v528_v43  ;;  %vm683_vm3 = vcmp.eq.f32.partialorder %v682_v55, 8.507059e+37 }
 0x3a1   :  { %v662_v45 = vmul.f32 %v1340_v61, %v661_v42  ;;  %935 = vmatpush.msrb.mxu3 %v1278_v10  ;;  %v658_v52 = vsel %vm655_vm8, %v657_v44, %v653_v0 }
 0x3a2   :  { %v778_v56 = vmul.f32 %v1702_v50, %v658_v52  ;;  %v685_v54 = vor.u32 1.1754944e-38, %v684_v39 }
 0x3a3   :  { %v663_v11 = vadd.f32 %v1340_v61, %v662_v45 }
 0x3a4   :  { %v1342_v3 = vpop.eup %1341  ;;  %1217 = vmatmul.msk.f32.gmra.mxu3 %vm402_vm2, %v778_v56 }
 0x3a5   :  { %v674_v48 = vmul.f32 %v1342_v3, %v528_v43  ;;  %v1281_v5 = vpop.permute.xlu2 %1280  ;;  %v667_v34 = vsel %vm666_vm11, %v1340_v61, %v663_v11  ;;  %vm679_vm13 = vweird.f32 %v1342_v3 }
 0x3a6   :  { %v1282_v46 = vunpack.i.l.bf16 %v1281_v5  ;;  %v1283_v28 = vunpack.i.h.bf16 %v1281_v5  ;;  %v672_v57 = vsel %vm669_vm12, %v671_v7, %v667_v34  ;;  %vm680_vm15 = vmor %vm678_vm14, %vm679_vm13 }
 0x3a7   :  { %v675_v49 = vsub.f32 1.0, %v674_v48  ;;  %v779_v53 = vmul.f32 %v1707_v47, %v672_v57  ;;  %v89_v47 = vld [vmem:[%s1886_s1 + $0x28] sm:$0xff] }
 0x3a8   :  { %v1286_v8 = vpop.permute.xlu1 %1285  ;;  %936 = vmatpush.msrb.mxu3 %v1282_v46  ;;  %1028 = vmatpush.msra.mxu1 %v89_v47 }
 0x3a9   :  { %v676_v50 = vmul.f32 %v1342_v3, %v675_v49  ;;  %v1287_v51 = vunpack.i.l.bf16 %v1286_v8  ;;  %v1288_v30 = vunpack.i.h.bf16 %v1286_v8 }
 0x3aa   :  { %937 = vmatpush.msrb.mxu3 %v1283_v28  ;;  %1029 = vmatpush.msra.mxu1 %v88_v31 }
 0x3ab   :  { %v677_v33 = vadd.f32 %v1342_v3, %v676_v50 }
 0x3ac   :  { %938 = vmatpush.msrb.mxu3 %v1287_v51 }
 0x3ad   :  { %v681_v36 = vsel %vm680_vm15, %v1342_v3, %v677_v33 }
 0x3ae   :  { %939 = vmatpush.msrb.mxu3 %v1288_v30  ;;  %v686_v62 = vsel %vm683_vm3, %v685_v54, %v681_v36 }
 0x3af   :  { %1218 = vmatmul.msk.f32.vlgmr.msrb.gmra.mxu3 %vm402_vm2, %v779_v53  ;;  %v780_v1 = vmul.f32 %v1714_v6, %v686_v62 }
 0x3b7   :  { %1219 = vmatmul.msk.f32.gmra.mxu3 %vm402_vm2, %v780_v1 }
 0x3c3   :  { %v531_v35 = vpop.xlane.xlu0 %530 }
 0x3c4   :  { %1343 = vrcp.f32 %v531_v35  ;;  %v698_v43 = vand.u32 2147483648, %v531_v35  ;;  %v696_v6 = vand.u32 2147483647, %v531_v35  ;;  %vm692_vm5 = vweird.f32 %v531_v35 }
 0x3c6   :  { %v699_v40 = vor.u32 1.1754944e-38, %v698_v43  ;;  %vm697_vm7 = vcmp.eq.f32.partialorder %v696_v6, 8.507059e+37 }
 0x3ca   :  { %v1344_v60 = vpop.eup %1343 }
 0x3cb   :  { %v688_v61 = vmul.f32 %v1344_v60, %v531_v35  ;;  %vm693_vm4 = vweird.f32 %v1344_v60  ;;  %v1782_v45 = vpop.xlane.xlu0 %539 }
 0x3cc   :  { %vm694_vm6 = vmor %vm692_vm5, %vm693_vm4  ;;  %v740_v43 = vand.u32 2147483648, %v1782_v45  ;;  %vm734_vm4 = vweird.f32 %v1782_v45 }
 0x3cd   :  { %v689_v9 = vsub.f32 1.0, %v688_v61 }
 0x3cf   :  { %v690_v41 = vmul.f32 %v1344_v60, %v689_v9 }
 0x3d1   :  { %v691_v38 = vadd.f32 %v1344_v60, %v690_v41 }
 0x3d3   :  { %v695_v44 = vsel %vm694_vm6, %v1344_v60, %v691_v38  ;;  %v537_v10 = vpop.xlane.xlu1 %536  ;;  %v1785_v4 = vpop.xlane.xlu0 %542  ;;  %v738_v38 = vand.u32 2147483647, %v1782_v45 }
 0x3d4   :  { %v700_v42 = vsel %vm697_vm7, %v699_v40, %v695_v44  ;;  %1345 = vrcp.f32 %v537_v10  ;;  %v726_v55 = vand.u32 2147483648, %v537_v10  ;;  %vm720_vm13 = vweird.f32 %v537_v10 }
 0x3d5   :  { %v781_v0 = vmul.f32 %v1726_v63, %v700_v42  ;;  %v724_v62 = vand.u32 2147483647, %v537_v10  ;;  %vm739_vm6 = vcmp.eq.f32.partialorder %v738_v38, 8.507059e+37 }
 0x3d6   :  { %v727_v61 = vor.u32 1.1754944e-38, %v726_v55 }
 0x3d7   :  { %1220 = vmatmul.msk.f32.gmra.mxu3 %vm402_vm2, %v781_v0  ;;  %vm725_vm15 = vcmp.eq.f32.partialorder %v724_v62, 8.507059e+37 }
 0x3da   :  { %v1346_v56 = vpop.eup %1345 }
 0x3db   :  { %v716_v11 = vmul.f32 %v1346_v56, %v537_v10  ;;  %vm721_vm12 = vweird.f32 %v1346_v56  ;;  %v741_v10 = vor.u32 1.1754944e-38, %v740_v43 }
 0x3dc   :  { %vm722_vm14 = vmor %vm720_vm13, %vm721_vm12 }
 0x3dd   :  { %v717_v48 = vsub.f32 1.0, %v716_v11 }
 0x3de   :  { %v534_v52 = vpop.xlane.xlu2 %533 }
 0x3df   :  { %1347 = vrcp.f32 %v534_v52  ;;  %v712_v49 = vand.u32 2147483648, %v534_v52  ;;  %v718_v34 = vmul.f32 %v1346_v56, %v717_v48  ;;  %v710_v8 = vand.u32 2147483647, %v534_v52 }
 0x3e0   :  { %1349 = vrcp.f32 %v1782_v45  ;;  %vm706_vm9 = vweird.f32 %v534_v52 }
 0x3e1   :  { %1351 = vrcp.f32 %v1785_v4  ;;  %v713_v57 = vor.u32 1.1754944e-38, %v712_v49  ;;  %vm711_vm11 = vcmp.eq.f32.partialorder %v710_v8, 8.507059e+37  ;;  %v719_v30 = vadd.f32 %v1346_v56, %v718_v34 }
 0x3e3   :  { %v723_v60 = vsel %vm722_vm14, %v1346_v56, %v719_v30 }
 0x3e4   :  { %v728_v9 = vsel %vm725_vm15, %v727_v61, %v723_v60 }
 0x3e5   :  { %v1348_v3 = vpop.eup %1347  ;;  %v783_v6 = vmul.f32 %v1737_v32, %v728_v9  ;;  %v754_v32 = vand.u32 2147483648, %v1785_v4 }
 0x3e6   :  { %v1350_v2 = vpop.eup %1349  ;;  %v702_v5 = vmul.f32 %v1348_v3, %v534_v52  ;;  %vm707_vm8 = vweird.f32 %v1348_v3  ;;  %v1790_v33 = vpop.xlane.xlu2 %545 }
 0x3e7   :  { %v730_v63 = vmul.f32 %v1350_v2, %v1782_v45  ;;  %vm708_vm10 = vmor %vm706_vm9, %vm707_vm8  ;;  %v1352_v53 = vpop.eup %1351  ;;  %1353 = vrcp.f32 %v1790_v33  ;;  %vm735_vm3 = vweird.f32 %v1350_v2  ;;  %vm748_vm8 = vweird.f32 %v1785_v4 }
 0x3e8   :  { %v703_v46 = vsub.f32 1.0, %v702_v5  ;;  %v744_v35 = vmul.f32 %v1352_v53, %v1785_v4  ;;  %vm736_vm5 = vmor %vm734_vm4, %vm735_vm3  ;;  %vm749_vm7 = vweird.f32 %v1352_v53  ;;  %v755_v5 = vor.u32 1.1754944e-38, %v754_v32 }
 0x3e9   :  { %v731_v51 = vsub.f32 1.0, %v730_v63  ;;  %vm750_vm9 = vmor %vm748_vm8, %vm749_vm7  ;;  %v768_v34 = vand.u32 2147483648, %v1790_v33  ;;  %vm762_vm12 = vweird.f32 %v1790_v33 }
 0x3ea   :  { %v704_v7 = vmul.f32 %v1348_v3, %v703_v46  ;;  %v745_v31 = vsub.f32 1.0, %v744_v35 }
 0x3eb   :  { %v732_v1 = vmul.f32 %v1350_v2, %v731_v51  ;;  %v769_v8 = vor.u32 1.1754944e-38, %v768_v34 }
 0x3ec   :  { %v852_v28 = vpop.f32.mrf.mxu3  ;;  %v705_v50 = vadd.f32 %v1348_v3, %v704_v7  ;;  %v746_v40 = vmul.f32 %v1352_v53, %v745_v31 }
 0x3ed   :  { %1226 = vmatmul.msk.f32.vlgmr.msra.gmra.mxu1 %vm231_vm1, %v852_v28  ;;  %v733_v41 = vadd.f32 %v1350_v2, %v732_v1 }
 0x3ee   :  { %v709_v39 = vsel %vm708_vm10, %v1348_v3, %v705_v50  ;;  %v747_v11 = vadd.f32 %v1352_v53, %v746_v40  ;;  %v752_v3 = vand.u32 2147483647, %v1785_v4  ;;  %v766_v4 = vand.u32 2147483647, %v1790_v33 }
 0x3ef   :  { %v714_v36 = vsel %vm711_vm11, %v713_v57, %v709_v39  ;;  %v737_v42 = vsel %vm736_vm5, %v1350_v2, %v733_v41 }
 0x3f0   :  { %v782_v54 = vmul.f32 %v1746_v59, %v714_v36  ;;  %v1354_v59 = vpop.eup %1353  ;;  %v742_v52 = vsel %vm739_vm6, %v741_v10, %v737_v42  ;;  %v751_v2 = vsel %vm750_vm9, %v1352_v53, %v747_v11  ;;  %vm753_vm10 = vcmp.eq.f32.partialorder %v752_v3, 8.507059e+37 }
 0x3f1   :  { %v758_v44 = vmul.f32 %v1354_v59, %v1790_v33  ;;  %v784_v45 = vmul.f32 %v1732_v37, %v742_v52  ;;  %v756_v63 = vsel %vm753_vm10, %v755_v5, %v751_v2  ;;  %vm763_vm11 = vweird.f32 %v1354_v59 }
 0x3f2   :  { %1221 = vmatmul.msk.f32.gmra.mxu3 %vm402_vm2, %v782_v54  ;;  %v785_v37 = vmul.f32 %v1739_v58, %v756_v63  ;;  %vm764_vm13 = vmor %vm762_vm12, %vm763_vm11  ;;  %vm767_vm14 = vcmp.eq.f32.partialorder %v766_v4, 8.507059e+37 }
 0x3f3   :  { %v759_v56 = vsub.f32 1.0, %v758_v44 }
 0x3f4   :  { %v855_v47 = vpop.f32.mrf.mxu3 }
 0x3f5   :  { %1227 = vmatmul.msk.f32.gmra.mxu1 %vm231_vm1, %v855_v47  ;;  %v760_v48 = vmul.f32 %v1354_v59, %v759_v56 }
 0x3f7   :  { %v761_v49 = vadd.f32 %v1354_v59, %v760_v48 }
 0x3f9   :  { %v765_v7 = vsel %vm764_vm13, %v1354_v59, %v761_v49 }
 0x3fa   :  { %1222 = vmatmul.msk.f32.gmra.mxu3 %vm402_vm2, %v783_v6  ;;  %v770_v50 = vsel %vm767_vm14, %v769_v8, %v765_v7 }
 0x3fb   :  { %v786_v51 = vmul.f32 %v1752_v29, %v770_v50  ;;  %v1827_v29 = vld [vmem:[%s1886_s1 + $0x38] ss:$0 sm:$0xff]  ;;  %s1383_s1 = smov 32  }
 0x3fc   :  { %v858_v0 = vpop.f32.mrf.mxu3 }
 0x3fd   :  { %1228 = vmatmul.msk.f32.gmra.mxu1 %vm231_vm1, %v858_v0 }
 0x402   :  { %1223 = vmatmul.msk.f32.gmra.mxu3 %vm402_vm2, %v784_v45 }
 0x404   :  { %v861_v46 = vpop.f32.mrf.mxu3 }
 0x405   :  { %1229 = vmatmul.msk.f32.gmra.mxu1 %vm231_vm1, %v861_v46 }
 0x40a   :  { %1224 = vmatmul.msk.f32.gmra.mxu3 %vm402_vm2, %v785_v37 }
 0x40c   :  { %v864_v28 = vpop.f32.mrf.mxu3 }
 0x40d   :  { %1230 = vmatmul.msk.f32.gmra.mxu1 %vm231_vm1, %v864_v28 }
 0x412   :  { %1225 = vmatmul.msk.f32.gmra.mxu3 %vm402_vm2, %v786_v51 }
 0x414   :  { %v867_v57 = vpop.f32.mrf.mxu3 }
 0x415   :  { %1231 = vmatmul.msk.f32.gmra.mxu1 %vm231_vm1, %v867_v57 }
 0x41c   :  { %v870_v58 = vpop.f32.mrf.mxu3 }
 0x41d   :  { %1232 = vmatmul.msk.f32.gmra.mxu1 %vm231_vm1, %v870_v58 }
 0x427   :  { %v873_v33 = vpop.f32.mrf.mxu3 }
 0x428   :  { %1233 = vmatmul.msk.f32.gmra.mxu1 %vm231_vm1, %v873_v33 }
 0x432   :  { %v941_v39 = vpop.f32.mrf.mxu3 }
 0x433   :  { %1234 = vmatmul.msk.f32.gmra.mxu1 %vm231_vm1, %v941_v39 }
 0x43a   :  { %v944_v30 = vpop.f32.mrf.mxu3 }
 0x43b   :  { %1235 = vmatmul.msk.f32.gmra.mxu1 %vm231_vm1, %v944_v30 }
 0x45a   :  { %v947_v53 = vpop.f32.mrf.mxu3 }
 0x45b   :  { %1236 = vmatmul.msk.f32.gmra.mxu1 %vm231_vm1, %v947_v53 }
 0x46a   :  { %v1031_v55 = vpop.f32.mrf.mxu1 }
 0x46b   :  { %v1032_v36 = vadd.f32 %v1827_v29, %v1031_v55 }
 0x46d   :  { %v1079_v54 = vadd.f32 %v1032_v36, %v1438_v12 }
 0x46f   :  { %1095 = vst.msk [vmem:[#allocation2] sm:$0xff] %vm93_vm0, %v1079_v54 }
 0x472   :  { %v1034_v62 = vpop.f32.mrf.mxu1 }
 0x473   :  { %v1035_v1 = vadd.f32 %v1827_v29, %v1034_v62 }
 0x475   :  { %v1080_v35 = vadd.f32 %v1035_v1, %v1442_v13  ;;  %v950_v60 = vpop.f32.mrf.mxu3 }
 0x476   :  { %1237 = vmatmul.msk.f32.gmra.mxu1 %vm231_vm1, %v950_v60 }
 0x477   :  { %1096 = vst.msk [vmem:[#allocation2 + $0x8] sm:$0xff] %vm93_vm0, %v1080_v35 }
 0x47a   :  { %v1037_v61 = vpop.f32.mrf.mxu1 }
 0x47b   :  { %v1038_v47 = vadd.f32 %v1827_v29, %v1037_v61 }
 0x47d   :  { %v1081_v9 = vadd.f32 %v1038_v47, %v1446_v14  ;;  %v953_v31 = vpop.f32.mrf.mxu3 }
 0x47e   :  { %1238 = vmatmul.msk.f32.gmra.mxu1 %vm231_vm1, %v953_v31 }
 0x47f   :  { %1097 = vst.msk [vmem:[#allocation2 + $0x10] sm:$0xff] %vm93_vm0, %v1081_v9 }
 0x482   :  { %v1040_v12 = vpop.f32.mrf.mxu1 }
 0x483   :  { %v1041_v41 = vadd.f32 %v1827_v29, %v1040_v12 }
 0x485   :  { %v1082_v13 = vadd.f32 %v1041_v41, %v1450_v15  ;;  %v956_v59 = vpop.f32.mrf.mxu3 }
 0x486   :  { %1239 = vmatmul.msk.f32.gmra.mxu1 %vm231_vm1, %v956_v59 }
 0x487   :  { %1098 = vst.msk [vmem:[#allocation2 + $0x18] sm:$0xff] %vm93_vm0, %v1082_v13 }
 0x48a   :  { %v1043_v43 = vpop.f32.mrf.mxu1 }
 0x48b   :  { %v1044_v6 = vadd.f32 %v1827_v29, %v1043_v43 }
 0x48d   :  { %v1083_v14 = vadd.f32 %v1044_v6, %v1454_v16  ;;  %v959_v38 = vpop.f32.mrf.mxu3 }
 0x48e   :  { %1240 = vmatmul.msk.f32.gmra.mxu1 %vm231_vm1, %v959_v38 }
 0x48f   :  { %1099 = vst.msk [vmem:[#allocation2 + $0x20] sm:$0xff] %vm93_vm0, %v1083_v14 }
 0x492   :  { %v1046_v40 = vpop.f32.mrf.mxu1 }
 0x493   :  { %v1047_v44 = vadd.f32 %v1827_v29, %v1046_v40 }
 0x495   :  { %v1084_v15 = vadd.f32 %v1047_v44, %v1458_v17  ;;  %v962_v42 = vpop.f32.mrf.mxu3 }
 0x496   :  { %1241 = vmatmul.msk.f32.gmra.mxu1 %vm231_vm1, %v962_v42 }
 0x497   :  { %1100 = vst.msk [vmem:[#allocation2 + $0x28] sm:$0xff] %vm93_vm0, %v1084_v15 }
 0x49a   :  { %v1049_v10 = vpop.f32.mrf.mxu1 }
 0x49b   :  { %v1050_v0 = vadd.f32 %v1827_v29, %v1049_v10 }
 0x49d   :  { %v1085_v16 = vadd.f32 %v1050_v0, %v1462_v18 }
 0x49f   :  { %1101 = vst.msk [vmem:[#allocation2 + $0x30] sm:$0xff] %vm93_vm0, %v1085_v16 }
 0x4a5   :  { %v1052_v52 = vpop.f32.mrf.mxu1 }
 0x4a6   :  { %v1053_v56 = vadd.f32 %v1827_v29, %v1052_v52 }
 0x4a8   :  { %v1086_v11 = vadd.f32 %v1053_v56, %v1468_v20 }
 0x4aa   :  { %1102 = vst.msk [vmem:[#allocation2 + $0x38] sm:$0xff] %vm93_vm0, %v1086_v11  ;;  %vm1135_vm0 = vcmask 523520  }
 0x4b0   :  { %v1055_v17 = vpop.f32.mrf.mxu1 }
 0x4b1   :  { %v1056_v32 = vadd.f32 %v1827_v29, %v1055_v17 }
 0x4b3   :  { %v1087_v45 = vadd.f32 %v1056_v32, %v1464_v19 }
 0x4b5   :  { %1111 = vrot.lane.b32.xlu0 %v1087_v45, %s1383_s1 }
 0x4b8   :  { %v1058_v3 = vpop.f32.mrf.mxu1 }
 0x4b9   :  { %v1059_v48 = vadd.f32 %v1827_v29, %v1058_v3 }
 0x4bb   :  { %v1088_v18 = vadd.f32 %v1059_v48, %v1472_v21 }
 0x4bd   :  { %1113 = vrot.lane.b32.xlu1 %v1088_v18, %s1383_s1 }
 0x4d8   :  { %v1061_v2 = vpop.f32.mrf.mxu1 }
 0x4d9   :  { %v1062_v5 = vadd.f32 %v1827_v29, %v1061_v2 }
 0x4db   :  { %v1089_v20 = vadd.f32 %v1062_v5, %v1476_v22 }
 0x4dd   :  { %1115 = vrot.lane.b32.xlu2 %v1089_v20, %s1383_s1 }
 0x4f3   :  { %v1064_v46 = vpop.f32.mrf.mxu1 }
 0x4f4   :  { %v1065_v63 = vadd.f32 %v1827_v29, %v1064_v46 }
 0x4f6   :  { %v1090_v49 = vadd.f32 %v1065_v63, %v1480_v23 }
 0x4f8   :  { %1117 = vrot.lane.b32.xlu0 %v1090_v49, %s1383_s1 }
 0x4fb   :  { %v1067_v19 = vpop.f32.mrf.mxu1 }
 0x4fc   :  { %v1068_v34 = vadd.f32 %v1827_v29, %v1067_v19 }
 0x4fe   :  { %v1091_v37 = vadd.f32 %v1068_v34, %v1484_v24 }
 0x500   :  { %1119 = vrot.lane.b32.xlu0 %v1091_v37, %s1383_s1 }
 0x503   :  { %v1070_v21 = vpop.f32.mrf.mxu1 }
 0x504   :  { %v1071_v4 = vadd.f32 %v1827_v29, %v1070_v21 }
 0x506   :  { %v1092_v7 = vadd.f32 %v1071_v4, %v1490_v25 }
 0x508   :  { %1121 = vrot.lane.b32.xlu1 %v1092_v7, %s1383_s1 }
 0x50b   :  { %v1073_v22 = vpop.f32.mrf.mxu1 }
 0x50c   :  { %v1074_v8 = vadd.f32 %v1827_v29, %v1073_v22 }
 0x50e   :  { %v1093_v28 = vadd.f32 %v1074_v8, %v1494_v26 }
 0x510   :  { %1123 = vrot.lane.b32.xlu2 %v1093_v28, %s1383_s1 }
 0x513   :  { %v1076_v23 = vpop.f32.mrf.mxu1 }
 0x514   :  { %v1077_v50 = vadd.f32 %v1827_v29, %v1076_v23 }
 0x516   :  { %v1094_v51 = vadd.f32 %v1077_v50, %v1498_v27 }
 0x518   :  { %1125 = vrot.lane.b32.xlu0 %v1094_v51, %s1383_s1 }
 0x527   :  { %v1112_v24 = vpop.permute.xlu0 %1111 }
 0x528   :  { %1136 = vst.msk [vmem:[#allocation2] sm:$0xff] %vm1135_vm0, %v1112_v24 }
 0x52f   :  { %v1114_v57 = vpop.permute.xlu1 %1113 }
 0x530   :  { %1137 = vst.msk [vmem:[#allocation2 + $0x8] sm:$0xff] %vm1135_vm0, %v1114_v57 }
 0x537   :  { %v1116_v25 = vpop.permute.xlu2 %1115 }
 0x538   :  { %1138 = vst.msk [vmem:[#allocation2 + $0x10] sm:$0xff] %vm1135_vm0, %v1116_v25 }
 0x56a   :  { %v1118_v58 = vpop.permute.xlu0 %1117  ;;  %v1124_v33 = vpop.permute.xlu2 %1123 }
 0x56b   :  { %1139 = vst.msk [vmem:[#allocation2 + $0x18] sm:$0xff] %vm1135_vm0, %v1118_v58 }
 0x56c   :  { %1142 = vst.msk [vmem:[#allocation2 + $0x30] sm:$0xff] %vm1135_vm0, %v1124_v33 }
 0x572   :  { %v1120_v26 = vpop.permute.xlu0 %1119 }
 0x573   :  { %1140 = vst.msk [vmem:[#allocation2 + $0x20] sm:$0xff] %vm1135_vm0, %v1120_v26 }
 0x57a   :  { %v1122_v27 = vpop.permute.xlu1 %1121 }
 0x57b   :  { %1141 = vst.msk [vmem:[#allocation2 + $0x28] sm:$0xff] %vm1135_vm0, %v1122_v27 }
 0x58a   :  { %v1126_v39 = vpop.permute.xlu0 %1125 }
 0x58b   :  { %1143 = vst.msk [vmem:[#allocation2 + $0x38] sm:$0xff] %vm1135_vm0, %v1126_v39 }
 0x58c   :  { %1156 = dma.vmem_to_hbm [thread:$0]  %s1149_s15, 1024, %s1151_s18, [#allocation3], %s1385_s19, %s1385_s19, %s1386_s20  }
 0x58d   :  { %1379 = dma.done.wait [#allocation3], 1024  }
 0x58e   :  { %1380 = vsyncadd [#allocation3], 4294966272 }
 0x58f   :  { %1161 = vsyncpa [#allocation3], 1 }

</bundles_post_ra>
